<compile_context>
chip_gen: v7x
topology: tpu7x:2x2x1
jax: 0.10.0
libtpu: 0.0.40
codegen_flags: <defaults>
</compile_context>

<pallas_src>
import functools

import jax
import jax.numpy as jnp
from jax import lax
from jax.experimental import pallas as pl
from jax.experimental.pallas import tpu as pltpu

LANE = 128
VMEM_LIMIT_BYTES = 48 * 1024 * 1024   # > v5e 16 MiB default, < v7x 64 MiB physical
UNROLL = 8                            # bounded partial unroll of the time loop


def _round_up(x, m):
    return (x + m - 1) // m * m


def _pad_to(x, shape):
    return jnp.pad(x, [(0, s - d) for d, s in zip(x.shape, shape)])


def _pick_batch_block(batch):
    """Pad batch to sublanes; pick a block big enough to fill MXU rows while
    keeping >=2 'parallel' grid points for v7x megacore when batch permits."""
    b8 = _round_up(batch, 8)
    if b8 >= 16:
        bb = min(128, _round_up(b8 // 2, 8))
    else:
        bb = b8
    return bb, _round_up(b8, bb)


# ---------------------------------------------------------------------------
# Kernel 1: tiled  y = x @ w + b  (hoisted GRU input projection & vocab head).
# ---------------------------------------------------------------------------
def _matmul_bias_kernel(x_ref, w_ref, b_ref, o_ref):
    o_ref[...] = (
        jnp.dot(x_ref[...], w_ref[...], preferred_element_type=jnp.float32)
        + b_ref[...]
    ).astype(o_ref.dtype)


def matmul_bias(x, w, b, *, out_dtype=jnp.float32, tile_m=512, tile_n=512):
    """M/N-tiled matmul+bias: software-pipelined DMA, VMEM-bounded tiles."""
    M, K = x.shape
    N = w.shape[1]
    tm = min(tile_m, M)
    tn = min(tile_n, N)
    Mp = _round_up(M, tm)
    Np = _round_up(N, tn)
    if Mp != M:
        x = jnp.pad(x, ((0, Mp - M), (0, 0)))
    if Np != N:
        w = jnp.pad(w, ((0, 0), (0, Np - N)))
        b = jnp.pad(b, ((0, 0), (0, Np - N)))
    # TODO(synk): add a K grid axis + f32 VMEM accumulator if K ever grows past
    # a few hundred lanes; here K is the padded embed/hidden dim (128).
    out = pl.pallas_call(
        _matmul_bias_kernel,
        out_shape=jax.ShapeDtypeStruct((Mp, Np), out_dtype),
        grid_spec=pltpu.PrefetchScalarGridSpec(
            num_scalar_prefetch=0,
            grid=(Mp // tm, Np // tn),
            in_specs=[
                pl.BlockSpec((tm, K), lambda i, j: (i, 0)),
                pl.BlockSpec((K, tn), lambda i, j: (0, j)),
                pl.BlockSpec((1, tn), lambda i, j: (0, j)),
            ],
            out_specs=pl.BlockSpec((tm, tn), lambda i, j: (i, j)),
        ),
        compiler_params=pltpu.CompilerParams(
            dimension_semantics=("parallel", "parallel"),
            vmem_limit_bytes=VMEM_LIMIT_BYTES),
    )(x, w, b)
    if Mp != M or Np != N:
        out = out[:M, :N]
    return out


# ---------------------------------------------------------------------------
# Shared GRU step.  Input gates gi already include x@Wih + bih + bhh_{r,z}
# (bf16); hidden/gate math stays f32.  hidden is a multiple of 128 so the
# r|z|n slices are lane-aligned.
# ---------------------------------------------------------------------------
def _gru_step(gi_t, h, whh, bhh_nb, hidden):
    gh = jnp.dot(h.astype(whh.dtype), whh, preferred_element_type=jnp.float32)
    r = jax.nn.sigmoid(gi_t[:, 0:hidden] + gh[:, 0:hidden])
    z = jax.nn.sigmoid(gi_t[:, hidden:2 * hidden] + gh[:, hidden:2 * hidden])
    n = jnp.tanh(gi_t[:, 2 * hidden:3 * hidden]
                 + r * (gh[:, 2 * hidden:3 * hidden] + bhh_nb))
    return n + z * (h - n)          # == (1 - z) * n + z * h


# ---------------------------------------------------------------------------
# Kernel 2: encoder recurrence (whole time loop inside one invocation).
# ---------------------------------------------------------------------------
def _encoder_kernel(gi_ref, whh_ref, bhhn_ref, h_out_ref, *,
                    hidden, seq_len, unroll):
    whh = whh_ref[...]
    bb = gi_ref.shape[1]
    # Broadcast the n-gate hh bias ONCE (hoisted out of the time loop).
    bhh_nb = jnp.broadcast_to(bhhn_ref[...], (bb, hidden))

    def step(t, h):
        return _gru_step(gi_ref[t], h, whh, bhh_nb, hidden)

    h0 = jnp.zeros((bb, hidden), jnp.float32)
    h_out_ref[...] = lax.fori_loop(0, seq_len, step, h0, unroll=unroll)


def encoder_gru(gi, whh, bhh_n, *, batch_block):
    T, Bp, H3 = gi.shape
    Hp = whh.shape[0]
    bb = batch_block
    assert Bp % bb == 0
    # TODO(synk): for long sequences, chunk T via pltpu.emit_pipeline inside
    # the kernel so the (T, bb, 3Hp) gi block stays bounded in VMEM.
    return pl.pallas_call(
        functools.partial(_encoder_kernel, hidden=Hp, seq_len=T,
                          unroll=min(UNROLL, T)),
        out_shape=jax.ShapeDtypeStruct((Bp, Hp), jnp.float32),
        grid_spec=pltpu.PrefetchScalarGridSpec(
            num_scalar_prefetch=0,
            grid=(Bp // bb,),
            in_specs=[
                pl.BlockSpec((T, bb, H3), lambda b: (0, b, 0)),
                # TODO(synk): on v7x, pipeline_mode=pl.Buffered(1) on these
                # grid-invariant weight blocks avoids duplicate buffering.
                pl.BlockSpec((Hp, H3), lambda b: (0, 0)),
                pl.BlockSpec((1, Hp), lambda b: (0, 0)),
            ],
            out_specs=pl.BlockSpec((bb, Hp), lambda b: (b, 0)),
        ),
        compiler_params=pltpu.CompilerParams(
            dimension_semantics=("parallel",),
            vmem_limit_bytes=VMEM_LIMIT_BYTES),
    )(gi, whh, bhh_n)


# ---------------------------------------------------------------------------
# Kernel 3: decoder recurrence.  Emits bf16 hidden states; the vocab
# projection is a follow-up tiled matmul (off the serial recurrence path).
# ---------------------------------------------------------------------------
def _decoder_kernel(gi_ref, h0_ref, whh_ref, bhhn_ref, hs_ref, *,
                    hidden, seq_len, unroll):
    whh = whh_ref[...]
    bb = gi_ref.shape[1]
    bhh_nb = jnp.broadcast_to(bhhn_ref[...], (bb, hidden))

    def step(t, h):
        h_new = _gru_step(gi_ref[t], h, whh, bhh_nb, hidden)
        hs_ref[t] = h_new.astype(hs_ref.dtype)
        return h_new

    lax.fori_loop(0, seq_len, step, h0_ref[...], unroll=unroll)


def decoder_gru(gi, h0, whh, bhh_n, *, batch_block):
    T, Bp, H3 = gi.shape
    Hp = whh.shape[0]
    bb = batch_block
    assert Bp % bb == 0
    return pl.pallas_call(
        functools.partial(_decoder_kernel, hidden=Hp, seq_len=T,
                          unroll=min(UNROLL, T)),
        out_shape=jax.ShapeDtypeStruct((T, Bp, Hp), jnp.bfloat16),
        grid_spec=pltpu.PrefetchScalarGridSpec(
            num_scalar_prefetch=0,
            grid=(Bp // bb,),
            in_specs=[
                pl.BlockSpec((T, bb, H3), lambda b: (0, b, 0)),
                pl.BlockSpec((bb, Hp), lambda b: (b, 0)),
                pl.BlockSpec((Hp, H3), lambda b: (0, 0)),
                pl.BlockSpec((1, Hp), lambda b: (0, 0)),
            ],
            out_specs=pl.BlockSpec((T, bb, Hp), lambda b: (0, b, 0)),
        ),
        compiler_params=pltpu.CompilerParams(
            dimension_semantics=("parallel",),
            vmem_limit_bytes=VMEM_LIMIT_BYTES),
    )(gi, h0, whh, bhh_n)


# ---------------------------------------------------------------------------
# Seq2Seq forward (wrapper glue).
# ---------------------------------------------------------------------------
def seq2seq_forward(kp, code_ids, doc_ids):
    """code_ids: (B, Tc) int32, doc_ids: (B, Td) int32 -> logits (Td, B, V)."""
    B, Tc = code_ids.shape
    _, Td = doc_ids.shape
    Hp = kp["enc_whh"].shape[0]
    Vp = kp["out_w"].shape[1]
    V = kp["vocab"]

    # Pad batch to a sublane/block multiple so the recurrent state and gi
    # blocks are sublane-dense and the grid divides evenly (no silent bb=B
    # fallback that could bust VMEM).
    bb, Bp = _pick_batch_block(B)
    code_p = jnp.pad(code_ids, ((0, Bp - B), (0, 0)))
    doc_p = jnp.pad(doc_ids, ((0, Bp - B), (0, 0)))

    # Embedding gathers, emitted directly in time-major flat layout (T*Bp, Ep).
    # TODO(synk): fuse the embedding row gather into the input-projection
    # kernel via PrefetchScalarGridSpec + pl.Element instead of an XLA gather.
    code_x = jnp.take(kp["enc_embed"], code_p.T.reshape(-1), axis=0)
    doc_x = jnp.take(kp["dec_embed"], doc_p.T.reshape(-1), axis=0)

    # Hoisted input-side matmuls: one tiled (T*Bp, Ep) x (Ep, 3Hp) per RNN,
    # with the r/z (ih + hh) biases and the n ih-bias folded in; gi kept bf16.
    enc_gi = matmul_bias(code_x, kp["enc_wih"], kp["enc_bfused"],
                         out_dtype=jnp.bfloat16).reshape(Tc, Bp, 3 * Hp)
    dec_gi = matmul_bias(doc_x, kp["dec_wih"], kp["dec_bfused"],
                         out_dtype=jnp.bfloat16).reshape(Td, Bp, 3 * Hp)

    # Encoder recurrence -> decoder initial state.
    dec_initial_state = encoder_gru(enc_gi, kp["enc_whh"], kp["enc_bhhn"],
                                    batch_block=bb)

    # Decoder recurrence (hidden states only; projection deferred).
    dec_hs = decoder_gru(dec_gi, dec_initial_state,
                         kp["dec_whh"], kp["dec_bhhn"], batch_block=bb)

    # Vocab projection as one big tiled matmul (near-full MXU occupancy,
    # Vp tiled along the N grid axis).
    logits_flat = matmul_bias(dec_hs.reshape(Td * Bp, Hp),
                              kp["out_w"], kp["out_b"],
                              out_dtype=jnp.float32)
    logits = logits_flat.reshape(Td, Bp, Vp)
    return logits[:, :B, :V]


# ---------------------------------------------------------------------------
# Parameters: logical (PyTorch-layout, f32) + kernel-ready (padded, bf16,
# bias-folded).
# ---------------------------------------------------------------------------
def init_params(key, vocab=32, embed=32, hidden=32):
    ks = jax.random.split(key, 12)
    s = 0.1

    def rnd(k, shape):
        return s * jax.random.normal(k, shape, jnp.float32)

    return {
        "enc_embed": rnd(ks[0], (vocab, embed)),
        "dec_embed": rnd(ks[1], (vocab, embed)),
        # PyTorch GRU layout, gate order [r | z | n].
        "enc_w_ih": rnd(ks[2], (3 * hidden, embed)),
        "enc_w_hh": rnd(ks[3], (3 * hidden, hidden)),
        "enc_b_ih": rnd(ks[4], (3 * hidden,)),
        "enc_b_hh": rnd(ks[5], (3 * hidden,)),
        "dec_w_ih": rnd(ks[6], (3 * hidden, embed)),
        "dec_w_hh": rnd(ks[7], (3 * hidden, hidden)),
        "dec_b_ih": rnd(ks[8], (3 * hidden,)),
        "dec_b_hh": rnd(ks[9], (3 * hidden,)),
        "out_w": rnd(ks[10], (vocab, hidden)),
        "out_b": jnp.zeros((vocab,), jnp.float32),
    }


def prepare_params(p, *, lane=LANE):
    """Pad to lane-aligned shapes, fold biases, transpose, cast weights to bf16."""
    V, E = p["enc_embed"].shape
    H = p["enc_w_hh"].shape[1]
    Ep, Hp, Vp = _round_up(E, lane), _round_up(H, lane), _round_up(V, lane)

    def prep_gru(w_ih, w_hh, b_ih, b_hh):
        def split(a):  # (3H, ...) -> r, z, n blocks
            return a[0:H], a[H:2 * H], a[2 * H:3 * H]

        wih_r, wih_z, wih_n = split(w_ih)
        whh_r, whh_z, whh_n = split(w_hh)
        bih_r, bih_z, bih_n = split(b_ih)
        bhh_r, bhh_z, bhh_n = split(b_hh)

        def tpad(w, in_p):     # (H, X) -> (Xp, Hp), zero-padded
            return _pad_to(w.T, (in_p, Hp))

        wih = jnp.concatenate(
            [tpad(wih_r, Ep), tpad(wih_z, Ep), tpad(wih_n, Ep)], axis=1)
        whh = jnp.concatenate(
            [tpad(whh_r, Hp), tpad(whh_z, Hp), tpad(whh_n, Hp)], axis=1)
        # Fold r/z (ih+hh) biases and the n ih-bias into the hoisted precompute.
        # NOTE: bhh_n must stay inside the r * (...) term -> kept separate.
        b_fused = jnp.concatenate([
            _pad_to(bih_r + bhh_r, (Hp,)),
            _pad_to(bih_z + bhh_z, (Hp,)),
            _pad_to(bih_n, (Hp,)),
        ])[None, :].astype(jnp.float32)                  # (1, 3Hp)
        bhhn = _pad_to(bhh_n, (Hp,))[None, :].astype(jnp.float32)  # (1, Hp)
        return (wih.astype(jnp.bfloat16), whh.astype(jnp.bfloat16),
                b_fused, bhhn)

    enc_wih, enc_whh, enc_bf, enc_bhhn = prep_gru(
        p["enc_w_ih"], p["enc_w_hh"], p["enc_b_ih"], p["enc_b_hh"])
    dec_wih, dec_whh, dec_bf, dec_bhhn = prep_gru(
        p["dec_w_ih"], p["dec_w_hh"], p["dec_b_ih"], p["dec_b_hh"])

    return {
        "vocab": V,
        "enc_embed": _pad_to(p["enc_embed"], (V, Ep)).astype(jnp.bfloat16),
        "dec_embed": _pad_to(p["dec_embed"], (V, Ep)).astype(jnp.bfloat16),
        "enc_wih": enc_wih, "enc_whh": enc_whh,
        "enc_bfused": enc_bf, "enc_bhhn": enc_bhhn,
        "dec_wih": dec_wih, "dec_whh": dec_whh,
        "dec_bfused": dec_bf, "dec_bhhn": dec_bhhn,
        "out_w": _pad_to(p["out_w"].T, (Hp, Vp)).astype(jnp.bfloat16),
        "out_b": _pad_to(p["out_b"], (Vp,))[None, :].astype(jnp.float32),
    }


# ---------------------------------------------------------------------------
# Plain-JAX reference (f32, PyTorch GRU semantics) for a correctness check.
# ---------------------------------------------------------------------------
def _gru_cell_ref(x, h, w_ih, w_hh, b_ih, b_hh):
    H = h.shape[1]
    gi = x @ w_ih.T + b_ih
    gh = h @ w_hh.T + b_hh
    r = jax.nn.sigmoid(gi[:, :H] + gh[:, :H])
    z = jax.nn.sigmoid(gi[:, H:2 * H] + gh[:, H:2 * H])
    n = jnp.tanh(gi[:, 2 * H:] + r * gh[:, 2 * H:])
    return (1.0 - z) * n + z * h


def seq2seq_reference(p, code_ids, doc_ids):
    B = code_ids.shape[0]
    H = p["enc_w_hh"].shape[1]
    h = jnp.zeros((B, H), jnp.float32)
    code_emb = p["enc_embed"][code_ids]
    for t in range(code_ids.shape[1]):
        h = _gru_cell_ref(code_emb[:, t], h, p["enc_w_ih"], p["enc_w_hh"],
                          p["enc_b_ih"], p["enc_b_hh"])
    doc_emb = p["dec_embed"][doc_ids]
    outs = []
    for t in range(doc_ids.shape[1]):
        h = _gru_cell_ref(doc_emb[:, t], h, p["dec_w_ih"], p["dec_w_hh"],
                          p["dec_b_ih"], p["dec_b_hh"])
        outs.append(h @ p["out_w"].T + p["out_b"])
    return jnp.stack(outs, axis=0)


if __name__ == "__main__":
    B, Tc, Td = 2, 8, 8
    VOCAB, EMBED, HIDDEN = 32, 32, 32

    key = jax.random.PRNGKey(0)
    k_param, k_code, k_doc = jax.random.split(key, 3)

    params = init_params(k_param, vocab=VOCAB, embed=EMBED, hidden=HIDDEN)
    kparams = prepare_params(params)

    code = jax.random.randint(k_code, (B, Tc), 0, VOCAB, dtype=jnp.int32)
    docstring = jax.random.randint(k_doc, (B, Td), 0, VOCAB, dtype=jnp.int32)

    logits = seq2seq_forward(kparams, code, docstring)
    jax.block_until_ready(logits)

    assert logits.shape == (Td, B, VOCAB)
    assert bool(jnp.all(jnp.isfinite(logits)))

    ref = seq2seq_reference(params, code, docstring)
    max_err = float(jnp.max(jnp.abs(logits.astype(jnp.float32) - ref)))
    assert max_err < 2e-2, f"mismatch vs reference: max_err={max_err}"

    print("KERNEL_OK")
</pallas_src>

<mosaic_0001>
module attributes {stable_mosaic.version = 11 : i64} {
  func.func @_matmul_bias_kernel(%arg0: i32, %arg1: i32, %arg2: memref<64x128xbf16, #tpu.memory_space<vmem>>, %arg3: memref<128x384xbf16, #tpu.memory_space<vmem>>, %arg4: memref<1x384xf32, #tpu.memory_space<vmem>>, %arg5: memref<64x384xbf16, #tpu.memory_space<vmem>>) attributes {dimension_semantics = [#tpu.dimension_semantics<parallel>, #tpu.dimension_semantics<parallel>], iteration_bounds = array<i64: 1, 1>, scalar_prefetch = 0 : i64, scratch_operands = 0 : i64, tpu.core_type = #tpu.core_type<tc>, window_params = [{transform_indices = @transform_0, window_bounds = array<i64: 64, 128>}, {transform_indices = @transform_1, window_bounds = array<i64: 128, 384>}, {transform_indices = @transform_2, window_bounds = array<i64: 1, 384>}, {transform_indices = @transform_3, window_bounds = array<i64: 64, 384>}]} {
    %c0 = arith.constant 0 : index
    %c0_0 = arith.constant 0 : index
    %0 = vector.load %arg2[%c0, %c0_0] : memref<64x128xbf16, #tpu.memory_space<vmem>>, vector<64x128xbf16>
    %c0_1 = arith.constant 0 : index
    %c0_2 = arith.constant 0 : index
    %1 = vector.load %arg3[%c0_1, %c0_2] : memref<128x384xbf16, #tpu.memory_space<vmem>>, vector<128x384xbf16>
    %cst = arith.constant dense<0.000000e+00> : vector<64x384xf32>
    %2 = tpu.matmul %0, %1, %cst {dimension_numbers = #tpu.dot_dimension_numbers<[1], [0], [0], [1], [0, 0, 1, 1], [], []>} : vector<64x128xbf16>, vector<128x384xbf16>, vector<64x384xf32> -> vector<64x384xf32>
    %c0_3 = arith.constant 0 : index
    %c0_4 = arith.constant 0 : index
    %3 = vector.load %arg4[%c0_3, %c0_4] : memref<1x384xf32, #tpu.memory_space<vmem>>, vector<1x384xf32>
    %4 = vector.broadcast %3 : vector<1x384xf32> to vector<64x384xf32>
    %5 = arith.addf %2, %4 : vector<64x384xf32>
    %6 = arith.truncf %5 : vector<64x384xf32> to vector<64x384xbf16>
    %c0_5 = arith.constant 0 : index
    %c0_6 = arith.constant 0 : index
    %7 = vector.load %arg5[%c0_5, %c0_6] : memref<64x384xbf16, #tpu.memory_space<vmem>>, vector<64x384xbf16>
    tpu.vector_store %arg5[%c0_5, %c0_6], %6 {strides = array<i32>} : memref<64x384xbf16, #tpu.memory_space<vmem>>, vector<64x384xbf16>,
    return
  }
  func.func @transform_0(%arg0: i32, %arg1: i32) -> (i32, i32) {
    %c0_i32 = arith.constant 0 : i32
    %c0_i32_0 = arith.constant 0 : i32
    return %arg0, %c0_i32 : i32, i32
  }
  func.func @transform_1(%arg0: i32, %arg1: i32) -> (i32, i32) {
    %c0_i32 = arith.constant 0 : i32
    %c0_i32_0 = arith.constant 0 : i32
    return %c0_i32, %arg1 : i32, i32
  }
  func.func @transform_2(%arg0: i32, %arg1: i32) -> (i32, i32) {
    %c0_i32 = arith.constant 0 : i32
    %c0_i32_0 = arith.constant 0 : i32
    return %c0_i32, %arg1 : i32, i32
  }
  func.func @transform_3(%arg0: i32, %arg1: i32) -> (i32, i32) {
    %c0_i32 = arith.constant 0 : i32
    return %arg0, %arg1 : i32, i32
  }
}

</mosaic_0001>

<bundles_post_ra>
// kernel: tpu_custom_call.1
= control target key start
LH: loop header
LB: loop body
LE: loop exit
PB: predicated region body
PF: predicated region fallthrough
CT: control target
= control target key end

     0   :  { %8 = vsyncpa [#allocation3], 0  ;;  %s814_s0 = inlined_call_operand.hbm [shape: bf16[64,128], index: 0, kind: input, shape index: {}]   ;;  %s815_s1 = inlined_call_operand.hbm [shape: bf16[128,384], index: 1, kind: input, shape index: {}]   ;;  %s816_s2 = inlined_call_operand.vmem [shape: f32[1,384], index: 2, kind: input, shape index: {}]   ;;  %s817_s3 = inlined_call_operand.hbm [shape: bf16[64,384], index: 3, kind: output, shape index: {}]  }
   0x1   :  { %9 = vsyncpa [#allocation6], 0 }
   0x2   :  { %10 = vsyncpa [#allocation4], 0  ;;  %s717_s12 = smov [#allocation2]   ;;  %s645_s16 = scalar_lea.hbm %s814_s0, 512 }
   0x3   :  { %s16_s13 = sshll.u32 %s717_s12, 4  ;;  %p646_p0 = scmp.ne.s32.totalorder %s814_s0, %s645_s16  ;;  %s17_s13 = int_to_ptr.vmem [resolvable:$true] %s16_s13 }
   0x4   :  { %p649_p1 = scmp.lt.u32.totalorder %s645_s16, %s814_s0 }
   0x6   :  { %p651_p2 = pnand %p649_p1, %p646_p0 }
   0x8   :  { %654 = shalt.err (!%p651_p2)
}
   0x9   :  { %s655_s21 = scalar_lea.vmem %s17_s13, 512  ;;  %p660_p4 = scmp.lt.s32.totalorder %s17_s13, %s17_s13 }
   0xa   :  { %p656_p3 = scmp.ne.s32.totalorder %s17_s13, %s655_s21  ;;  %p661_p5 = scmp.lt.s32.totalorder %s655_s21, %s655_s21 }
   0xc   :  { %p662_p6 = por %p661_p5, %p660_p4 }
   0xe   :  { %p663_p7 = pnand %p662_p6, %p656_p3 }
  0x10   :  { %666 = shalt.err (!%p663_p7)
}
  0x11   :  { %s718_s22 = smov 64   ;;  %s719_s23 = smov 4  }
  0x12   :  { %22 = dma.hbm_to_vmem [thread:$0]  %s814_s0, 512, %s17_s13, [#allocation3], %s718_s22, %s718_s22, %s719_s23  }
  0x13   :  { %s720_s26 = smov [#allocation5]   ;;  %s667_s30 = scalar_lea.hbm %s815_s1, 3072 }
  0x14   :  { %s28_s27 = sshll.u32 %s720_s26, 4  ;;  %p668_p8 = scmp.ne.s32.totalorder %s815_s1, %s667_s30  ;;  %s29_s27 = int_to_ptr.vmem [resolvable:$true] %s28_s27 }
  0x15   :  { %p671_p9 = scmp.lt.u32.totalorder %s667_s30, %s815_s1 }
  0x17   :  { %p673_p10 = pnand %p671_p9, %p668_p8 }
  0x19   :  { %676 = shalt.err (!%p673_p10)
}
  0x1a   :  { %s677_s8 = scalar_lea.vmem %s29_s27, 3072  ;;  %p682_p12 = scmp.lt.s32.totalorder %s29_s27, %s29_s27 }
  0x1b   :  { %p678_p11 = scmp.ne.s32.totalorder %s29_s27, %s677_s8  ;;  %p683_p13 = scmp.lt.s32.totalorder %s677_s8, %s677_s8 }
  0x1d   :  { %p684_p0 = por %p683_p13, %p682_p12 }
  0x1f   :  { %p685_p1 = pnand %p684_p0, %p678_p11 }
  0x21   :  { %688 = shalt.err (!%p685_p1)
}
  0x22   :  { %s721_s0 = smov 192   ;;  %s722_s9 = smov 12  }
  0x23   :  { %34 = dma.hbm_to_vmem [thread:$0]  %s815_s1, 3072, %s29_s27, [#allocation6], %s721_s0, %s721_s0, %s722_s9  }
  0x24   :  { %711 = dma.done.wait [#allocation3], 512  }
  0x25   :  { %712 = vsyncadd [#allocation3], 4294966784 }
  0x26   :  { %713 = dma.done.wait [#allocation6], 3072  }
  0x27   :  { %714 = vsyncadd [#allocation6], 4294964224  ;;  %v723_v0 = vmov 0   ;;  %v609_v1 = vld [vmem:[#allocation5 + $0x4] ss:$12 sps:$4 sm:$0xff]   ;;  %v641_v26 = vld [vmem:[#allocation2 + $0x8] sm:$0xff]   ;;  %v86_v29 = vlaneseq }
  0x28   :  { %285 = vmatprep.mubr.bf16.mxu0 %v723_v0  ;;  %v611_v2 = vld [vmem:[#allocation5] ss:$12 sps:$4 sm:$0xff]   ;;  %253 = vmatprep.subr.bf16.mxu0 %v609_v1  ;;  %v612_v3 = vld [vmem:[#allocation5 + $0x1c] ss:$12 sps:$4 sm:$0xff]   ;;  %v614_v4 = vld [vmem:[#allocation5 + $0x18] ss:$12 sps:$4 sm:$0xff]  }
  0x29   :  { %254 = vmatpush1.bf16.msra.mxu0 %v611_v2  ;;  %v615_v5 = vld [vmem:[#allocation5 + $0x34] ss:$12 sps:$4 sm:$0xff]   ;;  %v617_v7 = vld [vmem:[#allocation5 + $0x30] ss:$12 sps:$4 sm:$0xff]   ;;  %v618_v8 = vld [vmem:[#allocation5 + $0x4c] ss:$12 sps:$4 sm:$0xff]  }
  0x2a   :  { %255 = vmatprep.subr.bf16.mxu0 %v612_v3  ;;  %v621_v6 = vld [vmem:[#allocation5 + $0x8] ss:$12 sps:$4 sm:$0xff]   ;;  %v625_v9 = vld [vmem:[#allocation5 + $0x20] ss:$12 sps:$4 sm:$0xff]   ;;  %v629_v10 = vld [vmem:[#allocation5 + $0x38] ss:$12 sps:$4 sm:$0xff]  }
  0x2b   :  { %577 = vmatprep.subr.bf16.mxu1 %v621_v6  ;;  %v620_v11 = vld [vmem:[#allocation5 + $0x48] ss:$12 sps:$4 sm:$0xff]   ;;  %v622_v12 = vld [vmem:[#allocation5 + $0x64] ss:$12 sps:$4 sm:$0xff]   ;;  %v624_v13 = vld [vmem:[#allocation5 + $0x60] ss:$12 sps:$4 sm:$0xff]  }
  0x2c   :  { %578 = vmatpush3.bf16.msra.mxu1 %v621_v6  ;;  %v633_v14 = vld [vmem:[#allocation5 + $0x50] ss:$12 sps:$4 sm:$0xff]   ;;  %v638_v16 = vld [vmem:[#allocation2] sm:$0xff]   ;;  %v637_v17 = vld [vmem:[#allocation5 + $0x68] ss:$12 sps:$4 sm:$0xff]   ;;  %v87_v30 = vshrl.u32 %v86_v29, 7 }
  0x2d   :  { %256 = vmatpush1.bf16.msra.mxu0 %v614_v4  ;;  %579 = vmatprep.subr.bf16.mxu1 %v625_v9  ;;  %v626_v15 = vld [vmem:[#allocation5 + $0x7c] ss:$12 sps:$4 sm:$0xff]   ;;  %v628_v18 = vld [vmem:[#allocation5 + $0x78] ss:$12 sps:$4 sm:$0xff]   ;;  %v630_v19 = vld [vmem:[#allocation5 + $0x94] ss:$12 sps:$4 sm:$0xff]  }
  0x2e   :  { %257 = vmatprep.subr.bf16.mxu0 %v615_v5  ;;  %593 = vmatprep.mubr.bf16.mxu1 %v638_v16  ;;  %v639_v20 = vld [vmem:[#allocation5 + $0x80] ss:$12 sps:$4 sm:$0xff]   ;;  %v632_v21 = vld [vmem:[#allocation5 + $0x90] ss:$12 sps:$4 sm:$0xff]   ;;  %v640_v23 = vld [vmem:[#allocation5 + $0x98] ss:$12 sps:$4 sm:$0xff]  }
  0x2f   :  { %v634_v22 = vld [vmem:[#allocation5 + $0xac] ss:$12 sps:$4 sm:$0xff]   ;;  %v636_v24 = vld [vmem:[#allocation5 + $0xa8] ss:$12 sps:$4 sm:$0xff]   ;;  %v642_v25 = vld [vmem:[#allocation5 + $0xb0] ss:$12 sps:$4 sm:$0xff]  }
  0x30   :  { %580 = vmatpush3.bf16.msra.mxu1 %v625_v9  ;;  %v643_v27 = vld [vmem:[#allocation2 + $0x10] sm:$0xff]   ;;  %v644_v28 = vld [vmem:[#allocation2 + $0x18] sm:$0xff]   ;;  %v88_v31 = vsub.s32 0, %v87_v30  ;;  %v84_v32 = vld [vmem:[%s816_s2] sm:$0x7]  ;;  %v92_v33 = vsub.s32 1, %v87_v30 }
  0x31   :  { %258 = vmatpush1.bf16.msra.mxu0 %v617_v7  ;;  %581 = vmatprep.subr.bf16.mxu1 %v629_v10  ;;  %v96_v36 = vsub.s32 2, %v87_v30  ;;  %s724_s2 = smov [#allocation7]  }
  0x32   :  { %259 = vmatprep.subr.bf16.mxu0 %v618_v8  ;;  %v779_v34 = vrot.slane %v84_v32, %v88_v31  ;;  %v781_v35 = vrot.slane %v84_v32, %v92_v33  ;;  %s492_s13 = sshll.u32 %s724_s2, 4  ;;  %s493_s13 = int_to_ptr.vmem [resolvable:$true] %s492_s13 }
  0x33   :  { %v97_v44 = vrot.slane %v84_v32, %v96_v36  ;;  %s689_s14 = scalar_lea.vmem %s493_s13, 1536  ;;  %p694_p3 = scmp.lt.s32.totalorder %s493_s13, %s493_s13 }
  0x34   :  { %582 = vmatpush3.bf16.msra.mxu1 %v629_v10  ;;  %p690_p2 = scmp.ne.s32.totalorder %s493_s13, %s689_s14  ;;  %p695_p4 = scmp.lt.s32.totalorder %s689_s14, %s689_s14 }
  0x35   :  { %260 = vmatpush1.bf16.msra.mxu0 %v620_v11  ;;  %583 = vmatprep.subr.bf16.mxu1 %v633_v14 }
  0x36   :  { %261 = vmatprep.subr.bf16.mxu0 %v622_v12  ;;  %p696_p5 = por %p695_p4, %p694_p3 }
  0x38   :  { %584 = vmatpush3.bf16.msra.mxu1 %v633_v14  ;;  %p697_p6 = pnand %p696_p5, %p690_p2 }
  0x39   :  { %262 = vmatpush1.bf16.msra.mxu0 %v624_v13  ;;  %585 = vmatprep.subr.bf16.mxu1 %v637_v17 }
  0x3a   :  { %263 = vmatprep.subr.bf16.mxu0 %v626_v15 }
  0x3c   :  { %586 = vmatpush3.bf16.msra.mxu1 %v637_v17 }
  0x3d   :  { %264 = vmatpush1.bf16.msra.mxu0 %v628_v18  ;;  %587 = vmatprep.subr.bf16.mxu1 %v639_v20 }
  0x3e   :  { %265 = vmatprep.subr.bf16.mxu0 %v630_v19 }
  0x40   :  { %588 = vmatpush3.bf16.msra.mxu1 %v639_v20 }
  0x41   :  { %266 = vmatpush1.bf16.msra.mxu0 %v632_v21  ;;  %589 = vmatprep.subr.bf16.mxu1 %v640_v23 }
  0x42   :  { %267 = vmatprep.subr.bf16.mxu0 %v634_v22 }
  0x44   :  { %590 = vmatpush3.bf16.msra.mxu1 %v640_v23 }
  0x45   :  { %268 = vmatpush1.bf16.msra.mxu0 %v636_v24  ;;  %591 = vmatprep.subr.bf16.mxu1 %v642_v25 }
  0x48   :  { %286 = vmatmul.mubr.bf16.vlgmr.msra.gmra.mrb[0].mxu0 %v638_v16  ;;  %592 = vmatpush3.bf16.msra.mxu1 %v642_v25 }
  0x49   :  { %295 = vmatprep.mubr.bf16.mxu0 %v723_v0 }
  0x4b   :  { %594 = vmatmul.mubr.bf16.vlgmr.msra.gmra.mrb[0].mxu1 %v641_v26 }
  0x4c   :  { %597 = vmatprep.mubr.bf16.mxu1 %v643_v27 }
  0x50   :  { %296 = vmatmul.mubr.bf16.gmra.mrb[4].mxu0 %v641_v26 }
  0x51   :  { %305 = vmatprep.mubr.bf16.mxu0 %v723_v0 }
  0x53   :  { %598 = vmatmul.mubr.bf16.gmra.mrb[4].mxu1 %v644_v28 }
  0x58   :  { %306 = vmatmul.mubr.bf16.gmra.mrb[8].mxu0 %v643_v27 }
  0x59   :  { %315 = vmatprep.mubr.bf16.mxu0 %v723_v0 }
  0x60   :  { %316 = vmatmul.mubr.bf16.gmra.mrb[12].mxu0 %v644_v28 }
 0x11b   :  { %v287_v37 = vpop.f32.mrb[0].mxu0 }
 0x11c   :  { %v288_v38 = vadd.f32 %v287_v37, %v779_v34  ;;  %v289_v39 = vpop.f32.mrb[1].mxu0 }
 0x11d   :  { %v290_v40 = vadd.f32 %v289_v39, %v781_v35  ;;  %v291_v41 = vpop.f32.mrb[2].mxu0 }
 0x11e   :  { %v292_v42 = vadd.f32 %v291_v41, %v779_v34  ;;  %v293_v43 = vpop.f32.mrb[3].mxu0  ;;  %v595_v48 = vpop.f32.mrb[0].mxu1 }
 0x11f   :  { %v549_v45 = vpack.c.bf16 %v290_v40, %v288_v38  ;;  %v294_v46 = vadd.f32 %v293_v43, %v781_v35  ;;  %v369_v49 = vadd.f32 %v595_v48, %v97_v44  ;;  %v360_v50 = vpop.f32.mrb[1].mxu1 }
 0x120   :  { %v361_v52 = vadd.f32 %v360_v50, %v97_v44  ;;  %v596_v53 = vpop.f32.mrb[2].mxu1 }
 0x121   :  { %471 = vst [vmem:[#allocation7] sm:$0xff] %v549_v45  ;;  %v551_v47 = vpack.c.bf16 %v294_v46, %v292_v42  ;;  %v554_v56 = vpack.c.bf16 %v369_v49, %v369_v49  ;;  %v372_v57 = vadd.f32 %v596_v53, %v97_v44  ;;  %v363_v58 = vpop.f32.mrb[3].mxu1 }
 0x122   :  { %v550_v61 = vpack.c.bf16 %v361_v52, %v361_v52  ;;  %v364_v62 = vadd.f32 %v363_v58, %v97_v44 }
 0x123   :  { %473 = vst [vmem:[#allocation7 + $0xc] sm:$0xff] %v551_v47  ;;  %v297_v51 = vpop.f32.mrb[4].mxu0  ;;  %476 = vst [vmem:[#allocation7 + $0x20] sm:$0xf] %v554_v56  ;;  %v556_v1 = vpack.c.bf16 %v372_v57, %v372_v57 }
 0x124   :  { %v298_v54 = vadd.f32 %v297_v51, %v779_v34  ;;  %v299_v55 = vpop.f32.mrb[5].mxu0  ;;  %472 = vst [vmem:[#allocation7 + $0x8] sm:$0xf] %v550_v61  ;;  %v552_v4 = vpack.c.bf16 %v364_v62, %v364_v62 }
 0x125   :  { %v300_v59 = vadd.f32 %v299_v55, %v781_v35  ;;  %v301_v60 = vpop.f32.mrb[6].mxu0  ;;  %478 = vst [vmem:[#allocation7 + $0x2c] sm:$0xf] %v556_v1 }
 0x126   :  { %v302_v63 = vadd.f32 %v301_v60, %v779_v34  ;;  %v303_v0 = vpop.f32.mrb[7].mxu0  ;;  %474 = vst [vmem:[#allocation7 + $0x14] sm:$0xf] %v552_v4  ;;  %v599_v6 = vpop.f32.mrb[4].mxu1 }
 0x127   :  { %v553_v2 = vpack.c.bf16 %v300_v59, %v298_v54  ;;  %v304_v3 = vadd.f32 %v303_v0, %v781_v35  ;;  %v385_v7 = vadd.f32 %v599_v6, %v97_v44  ;;  %v376_v8 = vpop.f32.mrb[5].mxu1 }
 0x128   :  { %v377_v10 = vadd.f32 %v376_v8, %v97_v44  ;;  %v600_v11 = vpop.f32.mrb[6].mxu1 }
 0x129   :  { %475 = vst [vmem:[#allocation7 + $0x18] sm:$0xff] %v553_v2  ;;  %v555_v5 = vpack.c.bf16 %v304_v3, %v302_v63  ;;  %v562_v14 = vpack.c.bf16 %v385_v7, %v385_v7  ;;  %v388_v15 = vadd.f32 %v600_v11, %v97_v44  ;;  %v379_v16 = vpop.f32.mrb[7].mxu1 }
 0x12a   :  { %v558_v19 = vpack.c.bf16 %v377_v10, %v377_v10  ;;  %v380_v20 = vadd.f32 %v379_v16, %v97_v44 }
 0x12b   :  { %477 = vst [vmem:[#allocation7 + $0x24] sm:$0xff] %v555_v5  ;;  %v307_v9 = vpop.f32.mrb[8].mxu0  ;;  %484 = vst [vmem:[#allocation7 + $0x50] sm:$0xf] %v562_v14  ;;  %v564_v23 = vpack.c.bf16 %v388_v15, %v388_v15 }
 0x12c   :  { %v308_v12 = vadd.f32 %v307_v9, %v779_v34  ;;  %v309_v13 = vpop.f32.mrb[9].mxu0  ;;  %480 = vst [vmem:[#allocation7 + $0x38] sm:$0xf] %v558_v19  ;;  %v560_v26 = vpack.c.bf16 %v380_v20, %v380_v20 }
 0x12d   :  { %v310_v17 = vadd.f32 %v309_v13, %v781_v35  ;;  %v311_v18 = vpop.f32.mrb[10].mxu0  ;;  %486 = vst [vmem:[#allocation7 + $0x5c] sm:$0xf] %v564_v23 }
 0x12e   :  { %v312_v21 = vadd.f32 %v311_v18, %v779_v34  ;;  %v313_v22 = vpop.f32.mrb[11].mxu0  ;;  %482 = vst [vmem:[#allocation7 + $0x44] sm:$0xf] %v560_v26 }
 0x12f   :  { %v557_v24 = vpack.c.bf16 %v310_v17, %v308_v12  ;;  %v314_v25 = vadd.f32 %v313_v22, %v781_v35 }
 0x131   :  { %479 = vst [vmem:[#allocation7 + $0x30] sm:$0xff] %v557_v24  ;;  %v559_v27 = vpack.c.bf16 %v314_v25, %v312_v21 }
 0x133   :  { %481 = vst [vmem:[#allocation7 + $0x3c] sm:$0xff] %v559_v27  ;;  %v317_v28 = vpop.f32.mrb[12].mxu0 }
 0x134   :  { %v318_v29 = vadd.f32 %v317_v28, %v779_v34  ;;  %v319_v30 = vpop.f32.mrb[13].mxu0 }
 0x135   :  { %v320_v31 = vadd.f32 %v319_v30, %v781_v35  ;;  %v321_v32 = vpop.f32.mrb[14].mxu0 }
 0x136   :  { %v322_v33 = vadd.f32 %v321_v32, %v779_v34  ;;  %v323_v36 = vpop.f32.mrb[15].mxu0 }
 0x137   :  { %v561_v37 = vpack.c.bf16 %v320_v31, %v318_v29  ;;  %v324_v38 = vadd.f32 %v323_v36, %v781_v35 }
 0x139   :  { %483 = vst [vmem:[#allocation7 + $0x48] sm:$0xff] %v561_v37  ;;  %v563_v39 = vpack.c.bf16 %v324_v38, %v322_v33 }
 0x13b   :  { %485 = vst [vmem:[#allocation7 + $0x54] sm:$0xff] %v563_v39 }
 0x13c   :  { %700 = shalt.err (!%p697_p6)
}
 0x13d   :  { %s701_s17 = scalar_lea.hbm %s817_s3, 1536 }
 0x13e   :  { %p702_p7 = scmp.ne.s32.totalorder %s817_s3, %s701_s17  ;;  %p705_p8 = scmp.lt.u32.totalorder %s701_s17, %s817_s3 }
 0x140   :  { %p707_p9 = pnand %p705_p8, %p702_p7 }
 0x142   :  { %710 = shalt.err (!%p707_p9)
}
 0x143   :  { %498 = dma.vmem_to_hbm [thread:$0]  %s493_s13, 1536, %s817_s3, [#allocation4], %s721_s0, %s721_s0, %s722_s9  }
 0x144   :  { %715 = dma.done.wait [#allocation4], 1536  }
 0x145   :  { %716 = vsyncadd [#allocation4], 4294965760 }
 0x146   :  { %502 = vsyncpa [#allocation3], 1 }
 0x147   :  { %503 = vsyncpa [#allocation6], 1 }
 0x148   :  { %504 = vsyncpa [#allocation4], 1 }

</bundles_post_ra>
